<compile_context>
chip_gen: v6e
topology: v6e:2x2x1
jax: 0.10.0
libtpu: 0.0.40
codegen_flags: <defaults>
</compile_context>

<pallas_src>
import functools

import jax
import jax.numpy as jnp
from jax import lax
from jax.experimental import pallas as pl
from jax.experimental.pallas import tpu as pltpu

_LANES = 128  # batch rows per row-group (one full lane dimension)


def _hamming_kernel(logits_ref, y_ref, out_ref, *, total_rows):
    x = logits_ref[...]                                    # (tbr, 128, C) native dtype
    y = y_ref[...]                                         # (tbr, 128)    int32
    tbr, lanes, c = x.shape

    # First-index argmax over the class axis (torch.argmax tie semantics).
    m = jnp.max(x, axis=-1, keepdims=True)                 # (tbr, 128, 1)
    cls = lax.broadcasted_iota(jnp.int32, x.shape, 2)      # (tbr, 128, C)
    idx = jnp.where(x == m, cls, jnp.int32(c))             # non-max -> C
    pred = jnp.min(idx, axis=-1)                           # (tbr, 128)  lane-dense

    # Mask rows past the real batch size (batch padding + partial last tile).
    grp = pl.program_id(0) * tbr + lax.broadcasted_iota(jnp.int32, (tbr, lanes), 0)
    row = grp * lanes + lax.broadcasted_iota(jnp.int32, (tbr, lanes), 1)
    wrong = jnp.logical_and(row < total_rows, pred != y)
    count = jnp.sum(wrong.astype(jnp.int32))               # exact int32 count

    # Lane-dense per-tile partial count: lane 0 holds the count, rest are 0.
    lane = lax.broadcasted_iota(jnp.int32, (1, 1, _LANES), 2)
    out_ref[...] = jnp.where(lane == 0, count, 0)


def _plan_tiles(B: int, C: int, itemsize: int, block_row_groups=None):
    """Pick row-groups-of-128 per tile + a scoped-VMEM limit, budgeting every
    double-buffered VMEM consumer (lane-padded logits + labels + output)."""
    R = -(-B // _LANES)                                    # row groups after padding
    padded_c = -(-C // _LANES) * _LANES                    # lane padding of the class axis
    grp_logits = _LANES * padded_c * itemsize              # VMEM bytes / group (logits tile)
    grp_labels = _LANES * 4                                # VMEM bytes / group (labels tile)

    # Generation-aware targets: bigger tiles + higher scoped limit on 128 MiB
    # VMEM chips (v5e/v6e); conservative on 64 MiB parts (v7x) or if unknown.
    try:
        vmem_cap = int(pltpu.get_tpu_info().vmem_capacity_bytes)
    except Exception:
        vmem_cap = None
    if vmem_cap is not None and vmem_cap >= 100 * 2**20:
        target, limit = 16 * 2**20, 64 * 2**20
    else:
        target, limit = 8 * 2**20, 40 * 2**20

    if block_row_groups is not None:
        tbr = int(block_row_groups)
    else:
        tbr = max(1, target // grp_logits)
        if tbr >= R and R > 8:
            # keep >= 2 tiles so the "parallel" axis feeds both v7x TensorCores
            tbr = max(8, ((R + 1) // 2 // 8) * 8)

    # Legalize: the labels block is (tbr, 128), so its sublane dim tbr must be
    # a multiple of 8 or equal to the full number of row groups.
    if tbr >= R:
        tbr = R
    elif R >= 8:
        tbr = max(8, (tbr // 8) * 8)
    else:
        tbr = R

    # Budget every double-buffered VMEM consumer and assert it fits.
    needed = 2 * tbr * (grp_logits + grp_labels) + 2 * _LANES * 4
    phys = vmem_cap if vmem_cap is not None else 128 * 2**20
    assert needed + (2 << 20) <= phys, (
        f"Hamming kernel tile (C={C}, row_groups={tbr}) needs {needed} bytes of VMEM, "
        f"exceeding this chip's capacity; the class axis would need tiling.")
    limit = min(max(limit, needed + (2 << 20)), phys)
    return tbr, R, limit


def hamming_loss(logits: jax.Array, y: jax.Array, *, block_row_groups: int | None = None) -> jax.Array:
    """logits: (B, C) float (any dtype), y: (B,) integer labels -> scalar float32."""
    B, C = logits.shape
    itemsize = jnp.dtype(logits.dtype).itemsize
    tbr, R, vmem_limit = _plan_tiles(B, C, itemsize, block_row_groups)
    Bp = R * _LANES
    num_tiles = -(-R // tbr)

    y32 = y.astype(jnp.int32)
    if Bp != B:                                            # only ragged batches pay the pad copy
        logits = jnp.pad(logits, ((0, Bp - B), (0, 0)))
        y32 = jnp.pad(y32, (0, Bp - B))
    x3 = logits.reshape(R, _LANES, C)                      # free, contiguous reshape
    y2 = y32.reshape(R, _LANES)                            # lane-dense labels

    kernel = functools.partial(_hamming_kernel, total_rows=B)

    partial_counts = pl.pallas_call(
        kernel,
        out_shape=jax.ShapeDtypeStruct((num_tiles, 1, _LANES), jnp.int32),
        grid=(num_tiles,),
        in_specs=[
            pl.BlockSpec((tbr, _LANES, C), lambda i: (i, 0, 0)),   # logits tile (native dtype)
            pl.BlockSpec((tbr, _LANES), lambda i: (i, 0)),         # lane-dense labels tile
        ],
        out_specs=pl.BlockSpec((1, 1, _LANES), lambda i: (i, 0, 0)),
        compiler_params=pltpu.CompilerParams(
            dimension_semantics=("parallel",),             # both TCs on v7x
            vmem_limit_bytes=vmem_limit,
        ),
    )(x3, y2)

    total_wrong = jnp.sum(partial_counts)                  # exact int32 reduction
    return jnp.float32(1.0) - (2.0 * total_wrong.astype(jnp.float32)) / jnp.float32(B * C)


if __name__ == "__main__":
    key = jax.random.PRNGKey(0)
    k1, k2, k3, k4 = jax.random.split(key, 4)

    def ref_loss(logits, y):
        C = logits.shape[1]
        preds = jnp.argmax(logits, axis=1)
        oh_p = jax.nn.one_hot(preds, C)
        oh_y = jax.nn.one_hot(y, C)
        return 1.0 - jnp.mean((oh_p != oh_y).astype(jnp.float32))

    # 1) small canonical shape (single tile; exercises the batch-padding mask)
    B, C = 8, 16
    logits = jax.random.normal(k1, (B, C), dtype=jnp.float32)
    y = jax.random.randint(k2, (B,), 0, C, dtype=jnp.int32)
    loss = jax.block_until_ready(hamming_loss(logits, y))
    ref = ref_loss(logits, y)
    assert jnp.allclose(loss, ref, atol=1e-6), (loss, ref)

    # 2) multi-tile + partial-last-tile path, native bf16 streaming, non-pow2 C
    B2, C2 = 2100, 10
    logits2 = jax.random.normal(k3, (B2, C2), dtype=jnp.float32).astype(jnp.bfloat16)
    y2 = jax.random.randint(k4, (B2,), 0, C2, dtype=jnp.int32)
    loss2 = jax.block_until_ready(hamming_loss(logits2, y2, block_row_groups=8))
    ref2 = ref_loss(logits2, y2)
    assert jnp.allclose(loss2, ref2, atol=1e-6), (loss2, ref2)

    print("KERNEL_OK")
</pallas_src>

<mosaic_0001>
module attributes {stable_mosaic.version = 11 : i64} {
  func.func @_hamming_kernel(%arg0: i32, %arg1: memref<1x128x16xf32, #tpu.memory_space<vmem>>, %arg2: memref<1x128xi32, #tpu.memory_space<vmem>>, %arg3: memref<1x1x128xi32, #tpu.memory_space<vmem>>) attributes {dimension_semantics = [#tpu.dimension_semantics<parallel>], iteration_bounds = array<i64: 1>, scalar_prefetch = 0 : i64, scratch_operands = 0 : i64, tpu.core_type = #tpu.core_type<tc>, window_params = [{transform_indices = @transform_0, window_bounds = array<i64: 1, 128, 16>}, {transform_indices = @transform_1, window_bounds = array<i64: 1, 128>}, {transform_indices = @transform_2, window_bounds = array<i64: 1, 1, 128>}]} {
    %c0 = arith.constant 0 : index
    %c0_0 = arith.constant 0 : index
    %c0_1 = arith.constant 0 : index
    %0 = vector.load %arg1[%c0, %c0_0, %c0_1] : memref<1x128x16xf32, #tpu.memory_space<vmem>>, vector<1x128x16xf32>
    %c0_2 = arith.constant 0 : index
    %c0_3 = arith.constant 0 : index
    %1 = vector.load %arg2[%c0_2, %c0_3] : memref<1x128xi32, #tpu.memory_space<vmem>>, vector<1x128xi32>
    %cst = arith.constant dense<0xFF800000> : vector<1x128xf32>
    %2 = vector.multi_reduction <maximumf>, %0, %cst [2] : vector<1x128x16xf32> to vector<1x128xf32>
    %3 = vector.shape_cast %2 : vector<1x128xf32> to vector<1x128x1xf32>
    %4 = tpu.iota {dimensions = array<i32: 2>} : vector<1x128x16xi32>
    %5 = vector.broadcast %3 : vector<1x128x1xf32> to vector<1x128x16xf32>
    %6 = arith.cmpf oeq, %0, %5 : vector<1x128x16xf32>
    %c16_i32 = arith.constant 16 : i32
    %7 = vector.broadcast %c16_i32 : i32 to vector<1x128x16xi32>
    %8 = arith.select %6, %4, %7 : vector<1x128x16xi1>, vector<1x128x16xi32>
    %cst_4 = arith.constant dense<2147483647> : vector<1x128xi32>
    %9 = vector.multi_reduction <minsi>, %8, %cst_4 [2] : vector<1x128x16xi32> to vector<1x128xi32>
    %c1_i32 = arith.constant 1 : i32
    %10 = arith.muli %arg0, %c1_i32 : i32
    %11 = tpu.iota {dimensions = array<i32: 0>} : vector<1x128xi32>
    %12 = vector.broadcast %10 : i32 to vector<1x128xi32>
    %13 = arith.addi %12, %11 : vector<1x128xi32>
    %c128_i32 = arith.constant 128 : i32
    %14 = vector.broadcast %c128_i32 : i32 to vector<1x128xi32>
    %15 = arith.muli %13, %14 : vector<1x128xi32>
    %16 = tpu.iota {dimensions = array<i32: 1>} : vector<1x128xi32>
    %17 = arith.addi %15, %16 : vector<1x128xi32>
    %c8_i32 = arith.constant 8 : i32
    %18 = vector.broadcast %c8_i32 : i32 to vector<1x128xi32>
    %19 = arith.cmpi slt, %17, %18 : vector<1x128xi32>
    %20 = arith.cmpi ne, %9, %1 : vector<1x128xi32>
    %21 = arith.andi %19, %20 : vector<1x128xi1>
    %22 = arith.extui %21 : vector<1x128xi1> to vector<1x128xi32>
    %23 = vector.shape_cast %22 : vector<1x128xi32> to vector<1x1x128xi32>
    %cst_5 = arith.constant dense<0> : vector<1xi32>
    %24 = vector.multi_reduction <add>, %23, %cst_5 [1, 2] : vector<1x1x128xi32> to vector<1xi32>
    %25 = vector.shape_cast %24 : vector<1xi32> to vector<1x1x1xi32>
    %26 = vector.extract %25[0, 0, 0] : i32 from vector<1x1x1xi32>
    %27 = tpu.iota {dimensions = array<i32: 2>} : vector<1x1x128xi32>
    %c0_i32 = arith.constant 0 : i32
    %28 = vector.broadcast %c0_i32 : i32 to vector<1x1x128xi32>
    %29 = arith.cmpi eq, %27, %28 : vector<1x1x128xi32>
    %c0_i32_6 = arith.constant 0 : i32
    %30 = vector.broadcast %26 : i32 to vector<1x1x128xi32>
    %31 = vector.broadcast %c0_i32_6 : i32 to vector<1x1x128xi32>
    %32 = arith.select %29, %30, %31 : vector<1x1x128xi1>, vector<1x1x128xi32>
    %c0_7 = arith.constant 0 : index
    %c0_8 = arith.constant 0 : index
    %c0_9 = arith.constant 0 : index
    %33 = vector.load %arg3[%c0_7, %c0_8, %c0_9] : memref<1x1x128xi32, #tpu.memory_space<vmem>>, vector<1x1x128xi32>
    tpu.vector_store %arg3[%c0_7, %c0_8, %c0_9], %32 {strides = array<i32>} : memref<1x1x128xi32, #tpu.memory_space<vmem>>, vector<1x1x128xi32>,
    return
  }
  func.func @transform_0(%arg0: i32) -> (i32, i32, i32) {
    %c0_i32 = arith.constant 0 : i32
    %c0_i32_0 = arith.constant 0 : i32
    %c0_i32_1 = arith.constant 0 : i32
    return %arg0, %c0_i32, %c0_i32_0 : i32, i32, i32
  }
  func.func @transform_1(%arg0: i32) -> (i32, i32) {
    %c0_i32 = arith.constant 0 : i32
    %c0_i32_0 = arith.constant 0 : i32
    return %arg0, %c0_i32 : i32, i32
  }
  func.func @transform_2(%arg0: i32) -> (i32, i32, i32) {
    %c0_i32 = arith.constant 0 : i32
    %c0_i32_0 = arith.constant 0 : i32
    %c0_i32_1 = arith.constant 0 : i32
    return %arg0, %c0_i32, %c0_i32_0 : i32, i32, i32
  }
}

</mosaic_0001>

<bundles_post_ra>
// kernel: tpu_custom_call.1
= control target key start
LH: loop header
LB: loop body
LE: loop exit
PB: predicated region body
PF: predicated region fallthrough
CT: control target
= control target key end

     0   :  { %vm29_vm0 = vcmask 130048   ;;  %s1181_s0 = inlined_call_operand.vmem [shape: f32[1,128,16], index: 0, kind: input, shape index: {}]   ;;  %s1182_s1 = inlined_call_operand.vmem [shape: s32[1,128], index: 1, kind: input, shape index: {}]   ;;  %s1183_s2 = inlined_call_operand.hbm [shape: s32[1,1,128], index: 2, kind: output, shape index: {}]  }
   0x1   :  { %v706_v0 = vld [vmem:[%s1181_s0] sm:$0xff]  ;;  %v711_v1 = vld [vmem:[%s1181_s0 + $0x10] sm:$0xff]  ;;  %v716_v2 = vld [vmem:[%s1181_s0 + $0x8] sm:$0xff] }
   0x2   :  { %v30_v3 = vsel %vm29_vm0, %v706_v0, -inf  ;;  %v36_v4 = vsel %vm29_vm0, %v711_v1, -inf  ;;  %v725_v5 = vld [vmem:[%s1181_s0 + $0x18] sm:$0xff]  ;;  %v33_v6 = vsel %vm29_vm0, %v716_v2, -inf  ;;  %v734_v8 = vld [vmem:[%s1181_s0 + $0x20] sm:$0xff]  ;;  %v739_v9 = vld [vmem:[%s1181_s0 + $0x28] sm:$0xff] }
   0x3   :  { %31 = vmax.xlane.f32.xlu0 %v30_v3  ;;  %37 = vmax.xlane.f32.xlu1 %v36_v4  ;;  %v39_v7 = vsel %vm29_vm0, %v725_v5, -inf }
   0x7   :  { %34 = vmax.xlane.f32.xlu0 %v33_v6  ;;  %40 = vmax.xlane.f32.xlu1 %v39_v7 }
   0x8   :  { %7 = vsyncpa [#allocation3], 0  ;;  %v42_v10 = vsel %vm29_vm0, %v734_v8, -inf  ;;  %v45_v11 = vsel %vm29_vm0, %v739_v9, -inf  ;;  %v748_v12 = vld [vmem:[%s1181_s0 + $0x30] sm:$0xff]  ;;  %v753_v13 = vld [vmem:[%s1181_s0 + $0x38] sm:$0xff]  ;;  %v78_v33 = vlaneseq }
   0x9   :  { %v48_v14 = vsel %vm29_vm0, %v748_v12, -inf  ;;  %v51_v15 = vsel %vm29_vm0, %v753_v13, -inf  ;;  %v762_v16 = vld [vmem:[%s1181_s0 + $0x40] sm:$0xff]  ;;  %v767_v17 = vld [vmem:[%s1181_s0 + $0x48] sm:$0xff]  ;;  %v776_v20 = vld [vmem:[%s1181_s0 + $0x50] sm:$0xff] }
   0xa   :  { %v54_v18 = vsel %vm29_vm0, %v762_v16, -inf  ;;  %v57_v19 = vsel %vm29_vm0, %v767_v17, -inf  ;;  %v781_v21 = vld [vmem:[%s1181_s0 + $0x58] sm:$0xff]  ;;  %v60_v22 = vsel %vm29_vm0, %v776_v20, -inf  ;;  %v790_v24 = vld [vmem:[%s1181_s0 + $0x60] sm:$0xff]  ;;  %v795_v25 = vld [vmem:[%s1181_s0 + $0x68] sm:$0xff] }
   0xb   :  { %43 = vmax.xlane.f32.xlu0 %v42_v10  ;;  %46 = vmax.xlane.f32.xlu1 %v45_v11  ;;  %v63_v23 = vsel %vm29_vm0, %v781_v21, -inf  ;;  %v66_v26 = vsel %vm29_vm0, %v790_v24, -inf  ;;  %v69_v27 = vsel %vm29_vm0, %v795_v25, -inf  ;;  %v804_v28 = vld [vmem:[%s1181_s0 + $0x70] sm:$0xff]  ;;  %v809_v29 = vld [vmem:[%s1181_s0 + $0x78] sm:$0xff]  ;;  %v833_v34 = vand.u32 127, %v78_v33 }
   0xc   :  { %v72_v30 = vsel %vm29_vm0, %v804_v28, -inf  ;;  %v75_v31 = vsel %vm29_vm0, %v809_v29, -inf  ;;  %v818_v32 = vld [vmem:[%s1182_s1] ss:$0 sm:$0xff]  ;;  %s687_s0 = smov [#allocation2]  }
   0xd   :  { %s649_s1 = sshll.u32 %s687_s0, 4  ;;  %s650_s1 = int_to_ptr.vmem [resolvable:$true] %s649_s1 }
   0xe   :  { %s664_s16 = scalar_lea.vmem %s650_s1, 16  ;;  %s668_s17 = scalar_lea.vmem %s650_s1, 32 }
   0xf   :  { %49 = vmax.xlane.f32.xlu0 %v48_v14  ;;  %52 = vmax.xlane.f32.xlu1 %v51_v15  ;;  %p665_p0 = scmp.ne.s32.totalorder %s650_s1, %s664_s16  ;;  %p669_p1 = scmp.lt.s32.totalorder %s650_s1, %s650_s1 }
  0x10   :  { %p670_p2 = scmp.lt.s32.totalorder %s668_s17, %s664_s16 }
  0x12   :  { %p671_p3 = por %p670_p2, %p669_p1 }
  0x13   :  { %55 = vmax.xlane.f32.xlu0 %v54_v18  ;;  %58 = vmax.xlane.f32.xlu1 %v57_v19 }
  0x14   :  { %p672_p4 = pnand %p671_p3, %p665_p0 }
  0x17   :  { %61 = vmax.xlane.f32.xlu0 %v60_v22  ;;  %64 = vmax.xlane.f32.xlu1 %v63_v23 }
  0x1b   :  { %67 = vmax.xlane.f32.xlu0 %v66_v26  ;;  %70 = vmax.xlane.f32.xlu1 %v69_v27 }
  0x1f   :  { %73 = vmax.xlane.f32.xlu0 %v72_v30  ;;  %76 = vmax.xlane.f32.xlu1 %v75_v31 }
  0x30   :  { %368 = vbcast.lane.b32.xlu1 %v818_v32, 264 }
  0x34   :  { %372 = vbcast.lane.b32.xlu1 %v818_v32, 272 }
  0x35   :  { %364 = vbcast.lane.b32.xlu0 %v818_v32, 256 }
  0x38   :  { %376 = vbcast.lane.b32.xlu1 %v818_v32, 280 }
  0x39   :  { %380 = vbcast.lane.b32.xlu0 %v818_v32, 288 }
  0x3c   :  { %384 = vbcast.lane.b32.xlu1 %v818_v32, 296 }
  0x3d   :  { %388 = vbcast.lane.b32.xlu0 %v818_v32, 304 }
  0x40   :  { %392 = vbcast.lane.b32.xlu1 %v818_v32, 312 }
  0x41   :  { %396 = vbcast.lane.b32.xlu0 %v818_v32, 320 }
  0x44   :  { %400 = vbcast.lane.b32.xlu1 %v818_v32, 328 }
  0x45   :  { %404 = vbcast.lane.b32.xlu0 %v818_v32, 336 }
  0x48   :  { %408 = vbcast.lane.b32.xlu1 %v818_v32, 344 }
  0x8c   :  { %v32_v35 = vpop.xlane.xlu0 %31  ;;  %v38_v36 = vpop.xlane.xlu1 %37 }
  0x8d   :  { %vm80_vm1 = vcmp.eq.f32.partialorder %v706_v0, %v32_v35  ;;  %vm82_vm2 = vcmp.eq.f32.partialorder %v711_v1, %v38_v36 }
  0x8e   :  { %v96_v37 = vsel %vm80_vm1, %v833_v34, 16  ;;  %v98_v38 = vsel %vm82_vm2, %v833_v34, 16 }
  0x8f   :  { %v840_v39 = vsel %vm29_vm0, %v96_v37, 2147483647  ;;  %v843_v40 = vsel %vm29_vm0, %v98_v38, 2147483647 }
  0x90   :  { %v35_v41 = vpop.xlane.xlu0 %34  ;;  %v41_v42 = vpop.xlane.xlu1 %40  ;;  %v114_v43 = vshra.s32 %v840_v39, 16  ;;  %v144_v44 = vshra.s32 %v843_v40, 16 }
  0x91   :  { %vm81_vm3 = vcmp.eq.f32.partialorder %v716_v2, %v35_v41  ;;  %vm83_vm4 = vcmp.eq.f32.partialorder %v725_v5, %v41_v42 }
  0x92   :  { %v97_v45 = vsel %vm81_vm3, %v833_v34, 16  ;;  %v99_v46 = vsel %vm83_vm4, %v833_v34, 16  ;;  %v851_v47 = vcvt.s32.f32 %v114_v43  ;;  %v860_v52 = vcvt.s32.f32 %v144_v44 }
  0x93   :  { %v854_v48 = vsel %vm29_vm0, %v97_v45, 2147483647  ;;  %v857_v49 = vsel %vm29_vm0, %v99_v46, 2147483647 }
  0x94   :  { %117 = vmin.xlane.f32.xlu0 %v851_v47  ;;  %v44_v50 = vpop.xlane.xlu0 %43  ;;  %v47_v51 = vpop.xlane.xlu1 %46  ;;  %v129_v53 = vshra.s32 %v854_v48, 16  ;;  %v159_v54 = vshra.s32 %v857_v49, 16 }
  0x95   :  { %vm84_vm5 = vcmp.eq.f32.partialorder %v734_v8, %v44_v50  ;;  %vm85_vm6 = vcmp.eq.f32.partialorder %v739_v9, %v47_v51 }
  0x96   :  { %v100_v55 = vsel %vm84_vm5, %v833_v34, 16  ;;  %v101_v56 = vsel %vm85_vm6, %v833_v34, 16  ;;  %v868_v57 = vcvt.s32.f32 %v129_v53  ;;  %v878_v62 = vcvt.s32.f32 %v159_v54 }
  0x97   :  { %v871_v58 = vsel %vm29_vm0, %v100_v55, 2147483647  ;;  %v874_v59 = vsel %vm29_vm0, %v101_v56, 2147483647 }
  0x98   :  { %147 = vmin.xlane.f32.xlu0 %v860_v52  ;;  %132 = vmin.xlane.f32.xlu1 %v868_v57  ;;  %v50_v60 = vpop.xlane.xlu0 %49  ;;  %v53_v61 = vpop.xlane.xlu1 %52  ;;  %v174_v63 = vshra.s32 %v871_v58, 16  ;;  %v189_v0 = vshra.s32 %v874_v59, 16 }
  0x99   :  { %vm86_vm7 = vcmp.eq.f32.partialorder %v748_v12, %v50_v60  ;;  %vm87_vm8 = vcmp.eq.f32.partialorder %v753_v13, %v53_v61 }
  0x9a   :  { %v102_v1 = vsel %vm86_vm7, %v833_v34, 16  ;;  %v103_v2 = vsel %vm87_vm8, %v833_v34, 16  ;;  %v886_v3 = vcvt.s32.f32 %v174_v63  ;;  %v896_v8 = vcvt.s32.f32 %v189_v0 }
  0x9b   :  { %v889_v4 = vsel %vm29_vm0, %v102_v1, 2147483647  ;;  %v892_v5 = vsel %vm29_vm0, %v103_v2, 2147483647 }
  0x9c   :  { %162 = vmin.xlane.f32.xlu1 %v878_v62  ;;  %177 = vmin.xlane.f32.xlu0 %v886_v3  ;;  %v56_v6 = vpop.xlane.xlu0 %55  ;;  %v59_v7 = vpop.xlane.xlu1 %58  ;;  %v204_v9 = vshra.s32 %v889_v4, 16  ;;  %v219_v10 = vshra.s32 %v892_v5, 16 }
  0x9d   :  { %vm88_vm9 = vcmp.eq.f32.partialorder %v762_v16, %v56_v6  ;;  %vm89_vm10 = vcmp.eq.f32.partialorder %v767_v17, %v59_v7 }
  0x9e   :  { %v104_v11 = vsel %vm88_vm9, %v833_v34, 16  ;;  %v105_v12 = vsel %vm89_vm10, %v833_v34, 16  ;;  %v904_v13 = vcvt.s32.f32 %v204_v9  ;;  %v914_v19 = vcvt.s32.f32 %v219_v10 }
  0x9f   :  { %v907_v14 = vsel %vm29_vm0, %v104_v11, 2147483647  ;;  %v910_v15 = vsel %vm29_vm0, %v105_v12, 2147483647 }
  0xa0   :  { %192 = vmin.xlane.f32.xlu1 %v896_v8  ;;  %207 = vmin.xlane.f32.xlu0 %v904_v13  ;;  %v62_v18 = vpop.xlane.xlu0 %61  ;;  %v65_v16 = vpop.xlane.xlu1 %64  ;;  %v234_v17 = vshra.s32 %v907_v14, 16  ;;  %v249_v22 = vshra.s32 %v910_v15, 16 }
  0xa1   :  { %vm90_vm11 = vcmp.eq.f32.partialorder %v776_v20, %v62_v18  ;;  %vm91_vm12 = vcmp.eq.f32.partialorder %v781_v21, %v65_v16 }
  0xa2   :  { %v106_v23 = vsel %vm90_vm11, %v833_v34, 16  ;;  %v107_v26 = vsel %vm91_vm12, %v833_v34, 16  ;;  %v922_v27 = vcvt.s32.f32 %v234_v17  ;;  %v932_v36 = vcvt.s32.f32 %v249_v22 }
  0xa3   :  { %v925_v30 = vsel %vm29_vm0, %v106_v23, 2147483647  ;;  %v928_v31 = vsel %vm29_vm0, %v107_v26, 2147483647  ;;  %v113_v17 = vand.u32 65535, %v840_v39 }
  0xa4   :  { %222 = vmin.xlane.f32.xlu1 %v914_v19  ;;  %237 = vmin.xlane.f32.xlu0 %v922_v27  ;;  %v68_v35 = vpop.xlane.xlu0 %67  ;;  %v71_v20 = vpop.xlane.xlu1 %70  ;;  %v264_v21 = vshra.s32 %v925_v30, 16  ;;  %v279_v37 = vshra.s32 %v928_v31, 16 }
  0xa5   :  { %vm92_vm13 = vcmp.eq.f32.partialorder %v790_v24, %v68_v35  ;;  %vm93_vm14 = vcmp.eq.f32.partialorder %v795_v25, %v71_v20  ;;  %v115_v26 = vcvt.s32.f32 %v113_v17  ;;  %v128_v35 = vand.u32 65535, %v854_v48 }
  0xa6   :  { %v108_v38 = vsel %vm92_vm13, %v833_v34, 16  ;;  %v109_v41 = vsel %vm93_vm14, %v833_v34, 16  ;;  %v940_v42 = vcvt.s32.f32 %v264_v21  ;;  %v950_v46 = vcvt.s32.f32 %v279_v37 }
  0xa7   :  { %v943_v43 = vsel %vm29_vm0, %v108_v38, 2147483647  ;;  %v946_v44 = vsel %vm29_vm0, %v109_v41, 2147483647  ;;  %v143_v20 = vand.u32 65535, %v843_v40  ;;  %v130_v41 = vcvt.s32.f32 %v128_v35 }
  0xa8   :  { %252 = vmin.xlane.f32.xlu1 %v932_v36  ;;  %267 = vmin.xlane.f32.xlu0 %v940_v42  ;;  %v74_v45 = vpop.xlane.xlu0 %73  ;;  %v77_v24 = vpop.xlane.xlu1 %76  ;;  %v294_v25 = vshra.s32 %v943_v43, 16  ;;  %v309_v50 = vshra.s32 %v946_v44, 16 }
  0xa9   :  { %vm94_vm15 = vcmp.eq.f32.partialorder %v804_v28, %v74_v45  ;;  %vm95_vm1 = vcmp.eq.f32.partialorder %v809_v29, %v77_v24  ;;  %v145_v39 = vcvt.s32.f32 %v143_v20  ;;  %v158_v45 = vand.u32 65535, %v857_v49 }
  0xaa   :  { %v110_v51 = vsel %vm94_vm15, %v833_v34, 16  ;;  %v111_v53 = vsel %vm95_vm1, %v833_v34, 16  ;;  %v958_v54 = vcvt.s32.f32 %v294_v25  ;;  %v968_v60 = vcvt.s32.f32 %v309_v50 }
  0xab   :  { %v961_v55 = vsel %vm29_vm0, %v110_v51, 2147483647  ;;  %v964_v56 = vsel %vm29_vm0, %v111_v53, 2147483647  ;;  %v173_v24 = vand.u32 65535, %v871_v58  ;;  %v160_v50 = vcvt.s32.f32 %v158_v45 }
  0xac   :  { %282 = vmin.xlane.f32.xlu1 %v950_v46  ;;  %297 = vmin.xlane.f32.xlu0 %v958_v54  ;;  %v324_v28 = vshra.s32 %v961_v55, 16  ;;  %v339_v29 = vshra.s32 %v964_v56, 16  ;;  %v981_v0 = vpop.permute.xlu1 %368  ;;  %v985_v2 = vpop.permute.xlu0 %364  ;;  %v188_v49 = vand.u32 65535, %v874_v59  ;;  %v203_v58 = vand.u32 65535, %v889_v4 }
  0xad   :  { %v175_v51 = vcvt.s32.f32 %v173_v24  ;;  %v218_v59 = vand.u32 65535, %v892_v5  ;;  %v233_v4 = vand.u32 65535, %v907_v14  ;;  %v248_v5 = vand.u32 65535, %v910_v15 }
  0xae   :  { %v972_v61 = vcvt.s32.f32 %v324_v28  ;;  %v976_v63 = vcvt.s32.f32 %v339_v29  ;;  %v190_v29 = vcvt.s32.f32 %v188_v49  ;;  %v205_v17 = vcvt.s32.f32 %v203_v58 }
  0xaf   :  { %v220_v20 = vcvt.s32.f32 %v218_v59  ;;  %v263_v14 = vand.u32 65535, %v925_v30  ;;  %v250_v45 = vcvt.s32.f32 %v248_v5  ;;  %v278_v15 = vand.u32 65535, %v928_v31 }
  0xb0   :  { %312 = vmin.xlane.f32.xlu1 %v968_v60  ;;  %327 = vmin.xlane.f32.xlu0 %v972_v61  ;;  %v983_v1 = vpop.permute.xlu1 %372  ;;  %v989_v7 = vpop.permute.xlu0 %380  ;;  %v293_v30 = vand.u32 65535, %v943_v43  ;;  %v323_v49 = vand.u32 65535, %v961_v55 }
  0xb1   :  { %v265_v24 = vcvt.s32.f32 %v263_v14  ;;  %v280_v43 = vcvt.s32.f32 %v278_v15 }
  0xb4   :  { %342 = vmin.xlane.f32.xlu1 %v976_v63  ;;  %v987_v6 = vpop.permute.xlu1 %376  ;;  %v993_v10 = vpop.permute.xlu0 %388 }
  0xb8   :  { %v991_v9 = vpop.permute.xlu1 %384  ;;  %v997_v12 = vpop.permute.xlu0 %396 }
  0xbc   :  { %v995_v11 = vpop.permute.xlu1 %392  ;;  %v1001_v16 = vpop.permute.xlu0 %404 }
  0xc0   :  { %v999_v18 = vpop.permute.xlu1 %400 }
  0xc4   :  { %v1004_v22 = vpop.permute.xlu1 %408 }
  0xc5   :  { %416 = vbcast.lane.b32.xlu1 %v818_v32, 360 }
  0xc6   :  { %412 = vbcast.lane.b32.xlu0 %v818_v32, 352 }
 0x11d   :  { %v1006_v23 = vpop.xlane.xlu0 %117 }
 0x11e   :  { %vm119_vm0 = vcmp.eq.f32.partialorder %v851_v47, %v1006_v23 }
 0x11f   :  { %v120_v21 = vsel %vm119_vm0, %v115_v26, inf }
 0x120   :  { %121 = vmin.xlane.f32.xlu0 %v120_v21  ;;  %v235_v21 = vcvt.s32.f32 %v233_v4 }
 0x121   :  { %v1012_v37 = vpop.xlane.xlu1 %132  ;;  %v1014_v38 = vpop.xlane.xlu0 %147 }
 0x122   :  { %vm134_vm2 = vcmp.eq.f32.partialorder %v868_v57, %v1012_v37  ;;  %vm149_vm3 = vcmp.eq.f32.partialorder %v860_v52, %v1014_v38  ;;  %v154_v4 = vcvt.f32.s32 %v1014_v38 }
 0x123   :  { %v135_v40 = vsel %vm134_vm2, %v130_v41, inf  ;;  %v150_v47 = vsel %vm149_vm3, %v145_v39, inf }
 0x124   :  { %136 = vmin.xlane.f32.xlu1 %v135_v40  ;;  %151 = vmin.xlane.f32.xlu0 %v150_v47  ;;  %v686_v40 = vmov 0   ;;  %v155_v14 = vshll.u32 %v154_v4, 16 }
 0x125   :  { %v1022_v48 = vpop.xlane.xlu1 %162  ;;  %v1024_v25 = vpop.xlane.xlu0 %177  ;;  %662 = vset.pattern.permute.xlu0 %v686_v40  ;;  %663 = vset.pattern.permute.xlu1 %v686_v40 }
 0x126   :  { %vm164_vm4 = vcmp.eq.f32.partialorder %v878_v62, %v1022_v48  ;;  %vm179_vm5 = vcmp.eq.f32.partialorder %v886_v3, %v1024_v25 }
 0x127   :  { %v165_v52 = vsel %vm164_vm4, %v160_v50, inf  ;;  %v180_v57 = vsel %vm179_vm5, %v175_v51, inf  ;;  %v295_v50 = vcvt.s32.f32 %v293_v30  ;;  %v308_v51 = vand.u32 65535, %v946_v44 }
 0x128   :  { %166 = vmin.xlane.f32.xlu1 %v165_v52  ;;  %181 = vmin.xlane.f32.xlu0 %v180_v57  ;;  %v338_v44 = vand.u32 65535, %v964_v56 }
 0x129   :  { %v1032_v53 = vpop.xlane.xlu1 %192  ;;  %v1034_v28 = vpop.xlane.xlu0 %207  ;;  %v310_v57 = vcvt.s32.f32 %v308_v51 }
 0x12a   :  { %vm194_vm6 = vcmp.eq.f32.partialorder %v896_v8, %v1032_v53  ;;  %vm209_vm7 = vcmp.eq.f32.partialorder %v904_v13, %v1034_v28 }
 0x12b   :  { %v195_v62 = vsel %vm194_vm6, %v190_v29, inf  ;;  %v210_v3 = vsel %vm209_vm7, %v205_v17, inf  ;;  %v325_v29 = vcvt.s32.f32 %v323_v49  ;;  %v340_v17 = vcvt.s32.f32 %v338_v44 }
 0x12c   :  { %196 = vmin.xlane.f32.xlu1 %v195_v62  ;;  %211 = vmin.xlane.f32.xlu0 %v210_v3 }
 0x12d   :  { %v1042_v26 = vpop.xlane.xlu1 %222  ;;  %v1044_v35 = vpop.xlane.xlu0 %237 }
 0x12e   :  { %vm224_vm8 = vcmp.eq.f32.partialorder %v914_v19, %v1042_v26  ;;  %vm239_vm9 = vcmp.eq.f32.partialorder %v922_v27, %v1044_v35  ;;  %v244_v44 = vcvt.f32.s32 %v1044_v35 }
 0x12f   :  { %v225_v8 = vsel %vm224_vm8, %v220_v20, inf  ;;  %v240_v13 = vsel %vm239_vm9, %v235_v21, inf }
 0x130   :  { %226 = vmin.xlane.f32.xlu1 %v225_v8  ;;  %241 = vmin.xlane.f32.xlu0 %v240_v13  ;;  %v169_v8 = vcvt.f32.s32 %v1022_v48 }
 0x131   :  { %v1052_v41 = vpop.xlane.xlu1 %252  ;;  %v1054_v39 = vpop.xlane.xlu0 %267 }
 0x132   :  { %vm254_vm10 = vcmp.eq.f32.partialorder %v932_v36, %v1052_v41  ;;  %vm269_vm11 = vcmp.eq.f32.partialorder %v940_v42, %v1054_v39  ;;  %v170_v30 = vshll.u32 %v169_v8, 16 }
 0x133   :  { %v255_v19 = vsel %vm254_vm10, %v250_v45, inf  ;;  %v270_v27 = vsel %vm269_vm11, %v265_v24, inf  ;;  %v184_v45 = vcvt.f32.s32 %v1024_v25 }
 0x134   :  { %256 = vmin.xlane.f32.xlu1 %v255_v19  ;;  %271 = vmin.xlane.f32.xlu0 %v270_v27  ;;  %v199_v19 = vcvt.f32.s32 %v1032_v53  ;;  %v214_v27 = vcvt.f32.s32 %v1034_v28  ;;  %v229_v53 = vcvt.f32.s32 %v1042_v26  ;;  %v259_v26 = vcvt.f32.s32 %v1052_v41 }
 0x135   :  { %v1064_v47 = vpop.xlane.xlu1 %282  ;;  %v1066_v31 = vpop.xlane.xlu0 %297 }
 0x136   :  { %vm284_vm12 = vcmp.eq.f32.partialorder %v950_v46, %v1064_v47  ;;  %vm299_vm13 = vcmp.eq.f32.partialorder %v958_v54, %v1066_v31 }
 0x137   :  { %v285_v36 = vsel %vm284_vm12, %v280_v43, inf  ;;  %v300_v42 = vsel %vm299_vm13, %v295_v50, inf  ;;  %v185_v50 = vshll.u32 %v184_v45, 16 }
 0x138   :  { %286 = vmin.xlane.f32.xlu1 %v285_v36  ;;  %301 = vmin.xlane.f32.xlu0 %v300_v42  ;;  %v200_v42 = vshll.u32 %v199_v19, 16 }
 0x139   :  { %v1074_v58 = vpop.xlane.xlu1 %312  ;;  %v1076_v52 = vpop.xlane.xlu0 %327 }
 0x13a   :  { %vm314_vm14 = vcmp.eq.f32.partialorder %v968_v60, %v1074_v58  ;;  %vm329_vm15 = vcmp.eq.f32.partialorder %v972_v61, %v1076_v52  ;;  %v124_v60 = vcvt.f32.s32 %v1006_v23  ;;  %v139_v61 = vcvt.f32.s32 %v1012_v37 }
 0x13b   :  { %v315_v46 = vsel %vm314_vm14, %v310_v57, inf  ;;  %v330_v54 = vsel %vm329_vm15, %v325_v29, inf  ;;  %v215_v57 = vshll.u32 %v214_v27, 16 }
 0x13c   :  { %316 = vmin.xlane.f32.xlu1 %v315_v46  ;;  %331 = vmin.xlane.f32.xlu0 %v330_v54  ;;  %v125_v20 = vshll.u32 %v124_v60, 16  ;;  %v140_v5 = vshll.u32 %v139_v61, 16  ;;  %v274_v61 = vcvt.f32.s32 %v1054_v39  ;;  %v289_v39 = vcvt.f32.s32 %v1064_v47 }
 0x13d   :  { %v1083_v55 = vpop.xlane.xlu1 %342  ;;  %v1089_v56 = vpop.permute.xlu0 %412  ;;  %v319_v47 = vcvt.f32.s32 %v1074_v58 }
 0x13e   :  { %vm344_vm1 = vcmp.eq.f32.partialorder %v976_v63, %v1083_v55  ;;  %v275_v41 = vshll.u32 %v274_v61, 16 }
 0x13f   :  { %v345_v59 = vsel %vm344_vm1, %v340_v17, inf }
 0x140   :  { %346 = vmin.xlane.f32.xlu1 %v345_v59 }
 0x141   :  { %v1094_v62 = vpop.permute.xlu1 %416 }
 0x151   :  { %424 = vbcast.lane.b32.xlu1 %v818_v32, 376 }
 0x152   :  { %420 = vbcast.lane.b32.xlu0 %v818_v32, 368 }
 0x1a9   :  { %v122_v3 = vpop.xlane.xlu0 %121 }
 0x1aa   :  { %v123_v21 = vcvt.f32.s32 %v122_v3  ;;  %v245_v3 = vshll.u32 %v244_v44, 16 }
 0x1ac   :  { %v126_v63 = vadd.s32 %v125_v20, %v123_v21 }
 0x1ad   :  { %v137_v13 = vpop.xlane.xlu1 %136  ;;  %v152_v32 = vpop.xlane.xlu0 %151 }
 0x1ae   :  { %v138_v24 = vcvt.f32.s32 %v137_v13  ;;  %v153_v23 = vcvt.f32.s32 %v152_v32  ;;  %vm426_vm0 = vcmp.ne.s32.totalorder %v126_v63, %v985_v2  ;;  %v304_v32 = vcvt.f32.s32 %v1066_v31 }
 0x1af   :  { %v442_v37 = vsel %vm426_vm0, 1, %v686_v40  ;;  %vm515_vm0 = vcmask 130112  }
 0x1b0   :  { %v141_v38 = vadd.s32 %v140_v5, %v138_v24  ;;  %v156_v15 = vadd.s32 %v155_v14, %v153_v23  ;;  %459 = vperm.xlu0 %662, %v442_v37   ;;  %v305_v19 = vshll.u32 %v304_v32, 16  ;;  %v552_v32 = vadd.s32 4294967240, %v833_v34 }
 0x1b1   :  { %v167_v43 = vpop.xlane.xlu1 %166  ;;  %v182_v48 = vpop.xlane.xlu0 %181 }
 0x1b2   :  { %v168_v51 = vcvt.f32.s32 %v167_v43  ;;  %v183_v49 = vcvt.f32.s32 %v182_v48  ;;  %vm427_vm2 = vcmp.ne.s32.totalorder %v141_v38, %v981_v0  ;;  %vm428_vm3 = vcmp.ne.s32.totalorder %v156_v15, %v983_v1 }
 0x1b3   :  { %v443_v25 = vsel %vm427_vm2, 1, %v686_v40  ;;  %v444_v17 = vsel %vm428_vm3, 1, %v686_v40  ;;  %v230_v1 = vshll.u32 %v229_v53, 16  ;;  %v334_v15 = vcvt.f32.s32 %v1076_v52 }
 0x1b4   :  { %v171_v2 = vadd.s32 %v170_v30, %v168_v51  ;;  %v186_v36 = vadd.s32 %v185_v50, %v183_v49  ;;  %462 = vperm.xlu1 %663, %v443_v25   ;;  %v349_v25 = vcvt.f32.s32 %v1083_v55  ;;  %vm522_vm2 = vcmask 195712  }
 0x1b5   :  { %v197_v29 = vpop.xlane.xlu1 %196  ;;  %v212_v28 = vpop.xlane.xlu0 %211  ;;  %v335_v58 = vshll.u32 %v334_v15, 16  ;;  %vm529_vm3 = vcmask 261312  }
 0x1b6   :  { %v198_v46 = vcvt.f32.s32 %v197_v29  ;;  %v213_v54 = vcvt.f32.s32 %v212_v28  ;;  %vm429_vm4 = vcmp.ne.s32.totalorder %v171_v2, %v987_v6  ;;  %vm430_vm5 = vcmp.ne.s32.totalorder %v186_v36, %v989_v7 }
 0x1b7   :  { %v445_v0 = vsel %vm429_vm4, 1, %v686_v40  ;;  %v446_v63 = vsel %vm430_vm5, 1, %v686_v40  ;;  %v260_v7 = vshll.u32 %v259_v26, 16  ;;  %v350_v28 = vshll.u32 %v349_v25, 16 }
 0x1b8   :  { %v201_v59 = vadd.s32 %v200_v42, %v198_v46  ;;  %v216_v60 = vadd.s32 %v215_v57, %v213_v54  ;;  %468 = vperm.xlu0 %662, %v445_v0   ;;  %465 = vperm.xlu1 %663, %v444_v17   ;;  %v510_v17 = vadd.s32 4294967288, %v833_v34  ;;  %vm536_vm4 = vcmask 326912  }
 0x1b9   :  { %v227_v35 = vpop.xlane.xlu1 %226  ;;  %v242_v4 = vpop.xlane.xlu0 %241  ;;  %vm543_vm5 = vcmask 392512  }
 0x1ba   :  { %v228_v20 = vcvt.f32.s32 %v227_v35  ;;  %v243_v6 = vcvt.f32.s32 %v242_v4  ;;  %vm431_vm6 = vcmp.ne.s32.totalorder %v201_v59, %v991_v9  ;;  %vm432_vm7 = vcmp.ne.s32.totalorder %v216_v60, %v993_v10 }
 0x1bb   :  { %v447_v21 = vsel %vm431_vm6, 1, %v686_v40  ;;  %v448_v23 = vsel %vm432_vm7, 1, %v686_v40  ;;  %v290_v10 = vshll.u32 %v289_v39, 16  ;;  %v517_v59 = vadd.s32 4294967280, %v833_v34 }
 0x1bc   :  { %v231_v5 = vadd.s32 %v230_v1, %v228_v20  ;;  %v246_v14 = vadd.s32 %v245_v3, %v243_v6  ;;  %474 = vperm.xlu0 %662, %v447_v21   ;;  %471 = vperm.xlu1 %663, %v446_v63   ;;  %v524_v1 = vadd.s32 4294967272, %v833_v34  ;;  %v531_v3 = vadd.s32 4294967264, %v833_v34 }
 0x1bd   :  { %v257_v8 = vpop.xlane.xlu1 %256  ;;  %v272_v13 = vpop.xlane.xlu0 %271  ;;  %vm550_vm6 = vcmask 458112   ;;  %vm557_vm7 = vcmask 523712  }
 0x1be   :  { %v258_v45 = vcvt.f32.s32 %v257_v8  ;;  %v273_v9 = vcvt.f32.s32 %v272_v13  ;;  %vm433_vm8 = vcmp.ne.s32.totalorder %v231_v5, %v995_v11  ;;  %vm434_vm9 = vcmp.ne.s32.totalorder %v246_v14, %v997_v12 }
 0x1bf   :  { %v449_v24 = vsel %vm433_vm8, 1, %v686_v40  ;;  %v450_v48 = vsel %vm434_vm9, 1, %v686_v40  ;;  %v320_v12 = vshll.u32 %v319_v47, 16  ;;  %vm564_vm8 = vcmask 589312  }
 0x1c0   :  { %v261_v37 = vadd.s32 %v260_v7, %v258_v45  ;;  %v276_v38 = vadd.s32 %v275_v41, %v273_v9  ;;  %480 = vperm.xlu0 %662, %v449_v24   ;;  %477 = vperm.xlu1 %663, %v448_v23   ;;  %v545_v41 = vadd.s32 4294967248, %v833_v34  ;;  %vm571_vm9 = vcmask 654912  }
 0x1c1   :  { %v287_v31 = vpop.xlane.xlu1 %286  ;;  %v302_v30 = vpop.xlane.xlu0 %301 }
 0x1c2   :  { %v288_v27 = vcvt.f32.s32 %v287_v31  ;;  %v303_v11 = vcvt.f32.s32 %v302_v30  ;;  %vm435_vm10 = vcmp.ne.s32.totalorder %v261_v37, %v999_v18  ;;  %vm436_vm11 = vcmp.ne.s32.totalorder %v276_v38, %v1001_v16 }
 0x1c3   :  { %v451_v43 = vsel %vm435_vm10, 1, %v686_v40  ;;  %v452_v42 = vsel %vm436_vm11, 1, %v686_v40  ;;  %v559_v38 = vadd.s32 4294967232, %v833_v34  ;;  %v566_v31 = vadd.s32 4294967224, %v833_v34 }
 0x1c4   :  { %v291_v50 = vadd.s32 %v290_v10, %v288_v27  ;;  %v306_v51 = vadd.s32 %v305_v19, %v303_v11  ;;  %486 = vperm.xlu0 %662, %v451_v43   ;;  %483 = vperm.xlu1 %663, %v450_v48   ;;  %v573_v48 = vadd.s32 4294967216, %v833_v34  ;;  %vm578_vm10 = vcmask 720512  }
 0x1c5   :  { %v317_v52 = vpop.xlane.xlu1 %316  ;;  %v332_v49 = vpop.xlane.xlu0 %331  ;;  %vm585_vm11 = vcmask 786112  }
 0x1c6   :  { %v318_v2 = vcvt.f32.s32 %v317_v52  ;;  %v333_v36 = vcvt.f32.s32 %v332_v49  ;;  %vm437_vm12 = vcmp.ne.s32.totalorder %v291_v50, %v1004_v22  ;;  %vm438_vm13 = vcmp.ne.s32.totalorder %v306_v51, %v1089_v56 }
 0x1c7   :  { %v453_v18 = vsel %vm437_vm12, 1, %v686_v40  ;;  %v454_v22 = vsel %vm438_vm13, 1, %v686_v40  ;;  %vm592_vm12 = vcmask 851712   ;;  %vm599_vm13 = vcmask 917312  }
 0x1c8   :  { %v321_v57 = vadd.s32 %v320_v12, %v318_v2  ;;  %492 = vperm.xlu0 %662, %v453_v18   ;;  %489 = vperm.xlu1 %663, %v452_v42   ;;  %v336_v53 = vadd.s32 %v335_v58, %v333_v36  ;;  %v580_v58 = vadd.s32 4294967208, %v833_v34  ;;  %v587_v18 = vadd.s32 4294967200, %v833_v34 }
 0x1c9   :  { %v347_v16 = vpop.xlane.xlu1 %346  ;;  %v421_v29 = vpop.permute.xlu0 %420 }
 0x1ca   :  { %v348_v44 = vcvt.f32.s32 %v347_v16  ;;  %vm439_vm14 = vcmp.ne.s32.totalorder %v321_v57, %v1094_v62  ;;  %vm440_vm15 = vcmp.ne.s32.totalorder %v336_v53, %v421_v29  ;;  %v1141_v62 = vshrl.u32 %v78_v33, 7 }
 0x1cb   :  { %v455_v55 = vsel %vm439_vm14, 1, %v686_v40  ;;  %v456_v0 = vsel %vm440_vm15, 1, %v686_v40  ;;  %v538_v33 = vadd.s32 4294967256, %v833_v34  ;;  %v594_v16 = vadd.s32 4294967192, %v833_v34 }
 0x1cc   :  { %498 = vperm.xlu0 %662, %v455_v55   ;;  %495 = vperm.xlu1 %663, %v454_v22   ;;  %v351_v46 = vadd.s32 %v350_v28, %v348_v44  ;;  %v513_v60 = vsub.s32 %v510_v17, %v1141_v62  ;;  %v508_v26 = vsub.s32 %v833_v34, %v1141_v62  ;;  %vm606_vm14 = vcmask 982912  }
 0x1cd   :  { %v425_v54 = vpop.permute.xlu1 %424  ;;  %v520_v4 = vsub.s32 %v517_v59, %v1141_v62  ;;  %v527_v6 = vsub.s32 %v524_v1, %v1141_v62  ;;  %v534_v7 = vsub.s32 %v531_v3, %v1141_v62  ;;  %v541_v13 = vsub.s32 %v538_v33, %v1141_v62 }
 0x1ce   :  { %vm441_vm1 = vcmp.ne.s32.totalorder %v351_v46, %v425_v54  ;;  %v548_v37 = vsub.s32 %v545_v41, %v1141_v62  ;;  %v555_v15 = vsub.s32 %v552_v32, %v1141_v62  ;;  %v562_v43 = vsub.s32 %v559_v38, %v1141_v62 }
 0x1cf   :  { %v457_v56 = vsel %vm441_vm1, 1, %v686_v40  ;;  %v569_v12 = vsub.s32 %v566_v31, %v1141_v62  ;;  %v576_v36 = vsub.s32 %v573_v48, %v1141_v62  ;;  %v583_v53 = vsub.s32 %v580_v58, %v1141_v62 }
 0x1d0   :  { %504 = vperm.xlu0 %662, %v457_v56   ;;  %501 = vperm.xlu1 %663, %v456_v0   ;;  %v590_v22 = vsub.s32 %v587_v18, %v1141_v62  ;;  %v601_v46 = vadd.s32 4294967184, %v833_v34  ;;  %v608_v54 = vadd.s32 4294967176, %v833_v34  ;;  %v597_v17 = vsub.s32 %v594_v16, %v1141_v62 }
 0x1d1   :  { %vm613_vm15 = vcmask 1048512  }
 0x22b   :  { %v460_v61 = vpop.permute.xlu0 %459 }
 0x22c   :  { %v509_v21 = vrot.slane %v460_v61, %v508_v26 }
 0x22f   :  { %v463_v35 = vpop.permute.xlu1 %462 }
 0x230   :  { %v514_v20 = vrot.slane %v463_v35, %v513_v60  ;;  %v356_v60 = vmul.u32 128, %v1141_v62  ;;  %v604_v35 = vsub.s32 %v601_v46, %v1141_v62 }
 0x232   :  { %v516_v39 = vsel %vm515_vm0, %v514_v20, %v509_v21  ;;  %v357_v33 = vadd.s32 %v356_v60, %v833_v34 }
 0x233   :  { %v466_v63 = vpop.permute.xlu1 %465  ;;  %v469_v5 = vpop.permute.xlu0 %468 }
 0x234   :  { %v521_v14 = vrot.slane %v466_v63, %v520_v4  ;;  %v528_v8 = vrot.slane %v469_v5, %v527_v6  ;;  %v611_v4 = vsub.s32 %v608_v54, %v1141_v62  ;;  %vm358_vm1 = vcmp.lt.s32.totalorder %v357_v33, 8 }
 0x236   :  { %v523_v45 = vsel %vm522_vm2, %v521_v14, %v516_v39  ;;  %vm618_vm2 = vcmask 1040384  }
 0x237   :  { %v472_v9 = vpop.permute.xlu1 %471  ;;  %v475_v24 = vpop.permute.xlu0 %474  ;;  %v530_v10 = vsel %vm529_vm3, %v528_v8, %v523_v45 }
 0x238   :  { %v535_v23 = vrot.slane %v472_v9, %v534_v7  ;;  %v542_v47 = vrot.slane %v475_v24, %v541_v13 }
 0x23a   :  { %v537_v30 = vsel %vm536_vm4, %v535_v23, %v530_v10  ;;  %vm639_vm4 = vcmp.eq.s32.totalorder %v833_v34, 0 }
 0x23b   :  { %v478_v19 = vpop.permute.xlu1 %477  ;;  %v481_v27 = vpop.permute.xlu0 %480  ;;  %v544_v50 = vsel %vm543_vm5, %v542_v47, %v537_v30 }
 0x23c   :  { %v549_v11 = vrot.slane %v478_v19, %v548_v37  ;;  %v556_v51 = vrot.slane %v481_v27, %v555_v15 }
 0x23e   :  { %v551_v52 = vsel %vm550_vm6, %v549_v11, %v544_v50 }
 0x23f   :  { %v484_v49 = vpop.permute.xlu1 %483  ;;  %v487_v25 = vpop.permute.xlu0 %486  ;;  %v558_v42 = vsel %vm557_vm7, %v556_v51, %v551_v52 }
 0x240   :  { %v563_v2 = vrot.slane %v484_v49, %v562_v43  ;;  %v570_v57 = vrot.slane %v487_v25, %v569_v12 }
 0x242   :  { %v565_v29 = vsel %vm564_vm8, %v563_v2, %v558_v42 }
 0x243   :  { %v490_v28 = vpop.permute.xlu1 %489  ;;  %v493_v44 = vpop.permute.xlu0 %492  ;;  %v572_v0 = vsel %vm571_vm9, %v570_v57, %v565_v29 }
 0x244   :  { %v577_v55 = vrot.slane %v490_v28, %v576_v36  ;;  %v584_v56 = vrot.slane %v493_v44, %v583_v53 }
 0x246   :  { %v579_v59 = vsel %vm578_vm10, %v577_v55, %v572_v0 }
 0x247   :  { %v496_v1 = vpop.permute.xlu1 %495  ;;  %v499_v26 = vpop.permute.xlu0 %498  ;;  %v586_v3 = vsel %vm585_vm11, %v584_v56, %v579_v59 }
 0x248   :  { %v591_v61 = vrot.slane %v496_v1, %v590_v22  ;;  %v598_v20 = vrot.slane %v499_v26, %v597_v17 }
 0x24a   :  { %v593_v6 = vsel %vm592_vm12, %v591_v61, %v586_v3 }
 0x24b   :  { %v502_v21 = vpop.permute.xlu1 %501  ;;  %v505_v63 = vpop.permute.xlu0 %504  ;;  %v600_v7 = vsel %vm599_vm13, %v598_v20, %v593_v6 }
 0x24c   :  { %v605_v5 = vrot.slane %v502_v21, %v604_v35  ;;  %v612_v14 = vrot.slane %v505_v63, %v611_v4 }
 0x24e   :  { %v607_v41 = vsel %vm606_vm14, %v605_v5, %v600_v7 }
 0x24f   :  { %v614_v39 = vsel %vm613_vm15, %v612_v14, %v607_v41 }
 0x250   :  { %vm615_vm0 = vcmp.ne.s32.totalorder %v614_v39, 0 }
 0x251   :  { %vm616_vm3 = vmand %vm358_vm1, %vm615_vm0 }
 0x252   :  { %v617_v62 = vsel %vm616_vm3, 1, %v686_v40 }
 0x253   :  { %v619_v8 = vsel %vm618_vm2, %v617_v62, 0 }
 0x254   :  { %v621_v13 = vshrl.u32 %v619_v8, 16  ;;  %v620_v32 = vand.u32 65535, %v619_v8 }
 0x256   :  { %v623_v45 = vcvt.s32.f32 %v621_v13  ;;  %v622_v9 = vcvt.s32.f32 %v620_v32 }
 0x258   :  { %626 = vadd.xlane.f32.xlu1 %v623_v45  ;;  %624 = vadd.xlane.f32.xlu0 %v622_v9 }
 0x2e1   :  { %v627_v24 = vpop.xlane.xlu1 %626  ;;  %v625_v23 = vpop.xlane.xlu0 %624 }
 0x2e2   :  { %v629_v37 = vcvt.f32.s32 %v627_v24  ;;  %v628_v10 = vcvt.f32.s32 %v625_v23 }
 0x2e4   :  { %v630_v38 = vshll.u32 %v629_v37, 16 }
 0x2e6   :  { %v631_v47 = vadd.s32 %v630_v38, %v628_v10 }
 0x2e8   :  { %v632_v15 = vrot.slane %v631_v47, 4 }
 0x2ea   :  { %v633_v31 = vadd.s32 %v632_v15, %v631_v47 }
 0x2ec   :  { %v634_v30 = vrot.slane %v633_v31, 2 }
 0x2ee   :  { %v635_v19 = vadd.s32 %v634_v30, %v633_v31 }
 0x2f0   :  { %v636_v27 = vrot.slane %v635_v19, 1 }
 0x2f2   :  { %v637_v11 = vadd.s32 %v636_v27, %v635_v19 }
 0x2f4   :  { %658 = vpush %v637_v11 }
 0x325   :  { %s659_s15 = spop %658 }
 0x326   :  { %v640_v40 = vstv %s659_s15 }
 0x327   :  { %v641_v43 = vsel %vm639_vm4, %v640_v40, 0 }
 0x328   :  { %642 = vst [vmem:[#allocation2] sm:$0x1] %v641_v43 }
 0x329   :  { %675 = shalt.err (!%p672_p4)
}
 0x32a   :  { %652 = dma.vmem_to_hbm [thread:$0]  %s650_s1, 16, %s1183_s2, [#allocation3]  }
 0x32b   :  { %684 = dma.done.wait [#allocation3], 16  }
 0x32c   :  { %685 = vsyncadd [#allocation3], 4294967280 }
 0x32d   :  { %656 = vsyncpa [#allocation3], 1 }

</bundles_post_ra>
